<compile_context>
chip_gen: v7x
topology: tpu7x:2x2x1
jax: 0.10.0
libtpu: 0.0.40
codegen_flags: <defaults>
</compile_context>

<pallas_src>
import functools

import jax
import jax.numpy as jnp
from jax.experimental import pallas as pl
from jax.experimental.pallas import tpu as pltpu


# ----------------------------- Pallas kernels ------------------------------ #
def _act_kernel(x_ref, o_ref, *, relu_type):
    x = x_ref[...].astype(jnp.float32)                 # in-vreg cast, free
    if relu_type == "relu":
        y = jnp.maximum(x, 0.0)
    elif relu_type == "leakyrelu":
        y = jnp.where(x >= 0, x, 0.2 * x)
    elif relu_type == "selu":
        alpha = 1.6732632423543772
        scale = 1.0507009873554805
        y = scale * jnp.where(x >= 0, x, alpha * jnp.expm1(x))
    else:
        raise ValueError(f"Relu type {relu_type} not support.")
    o_ref[...] = y.astype(o_ref.dtype)


def _prelu_kernel(x_ref, a_ref, o_ref):
    x = x_ref[...].astype(jnp.float32)
    # a_ref is (TILE_M, 1): per-(n, c) slope broadcast across the lanes.
    y = jnp.where(x >= 0, x, a_ref[...] * x)
    o_ref[...] = y.astype(o_ref.dtype)


# ------------------------------ tiling helpers ------------------------------ #
_TILE_M_CAP = 512     # sublane tile cap (multiple of 8/16/32 for any dtype)
_TILE_L_CAP = 1024    # lane tile cap   (multiple of 128), 2 MiB f32 tiles


def _flat_slab_shape(total, fallback):
    """Lane-dense (rows, cols) factorization of a flat tensor, cols % 128 == 0."""
    for cols in (2048, 1024, 512, 256, 128):
        if total % cols == 0 and (total // cols) % 8 == 0:
            return total // cols, cols
    for cols in (2048, 1024, 512, 256, 128):
        if total % cols == 0:
            return total // cols, cols
    return fallback


def _pick_tiles(rows, cols):
    tile_m = rows if rows <= _TILE_M_CAP else _TILE_M_CAP
    tile_l = cols if cols <= _TILE_L_CAP else _TILE_L_CAP
    # Give megacore (v7x) at least 2 parallel steps when the shape allows it.
    if pl.cdiv(rows, tile_m) * pl.cdiv(cols, tile_l) == 1 and tile_l % 256 == 0:
        tile_l //= 2
    return tile_m, tile_l


# --------------------------------- wrapper ---------------------------------- #
def relu_layer_forward(x_nchw, relu_type="relu", prelu_weight=None):
    """Pallas forward matching ReluLayer.forward (NCHW in, NCHW out)."""
    relu_type = relu_type.lower()
    if relu_type == "none":
        return x_nchw                                   # direct pass, no copy

    if relu_type not in ("relu", "leakyrelu", "prelu", "selu"):
        raise ValueError(f"Relu type {relu_type} not support.")

    N, C, H, W = x_nchw.shape
    out_dtype = x_nchw.dtype
    itemsize = jnp.dtype(out_dtype).itemsize
    total = N * C * H * W

    if relu_type == "prelu":
        # (rows, lanes) = (N*C, H*W) so the per-(n, c) slope is a column.
        M, L = N * C, H * W
        if prelu_weight is None:
            prelu_weight = jnp.full((C,), 0.25, jnp.float32)   # nn.PReLU default
        slope_col = jnp.tile(prelu_weight.astype(jnp.float32), (N,)).reshape(M, 1)
        x2d = x_nchw.reshape(M, L)                      # free bitcast view

        tile_m, tile_l = _pick_tiles(M, L)
        grid = (pl.cdiv(M, tile_m), pl.cdiv(L, tile_l))

        y2d = pl.pallas_call(
            _prelu_kernel,
            out_shape=jax.ShapeDtypeStruct((M, L), out_dtype),
            grid=grid,
            in_specs=[
                pl.BlockSpec((tile_m, tile_l), lambda i, j: (i, j)),
                pl.BlockSpec((tile_m, 1), lambda i, j: (i, 0)),
            ],
            out_specs=pl.BlockSpec((tile_m, tile_l), lambda i, j: (i, j)),
            compiler_params=pltpu.CompilerParams(
                dimension_semantics=("parallel", "parallel")),
            cost_estimate=pl.CostEstimate(
                flops=2 * total, transcendentals=0,
                bytes_accessed=2 * total * itemsize),
        )(x2d, slope_col)
        return y2d.reshape(N, C, H, W)

    # relu / leakyrelu / selu: fully elementwise -> flat lane-dense slab.
    rows, cols = _flat_slab_shape(total, fallback=(N * C, H * W))
    x2d = x_nchw.reshape(rows, cols)                    # free bitcast view

    tile_m, tile_l = _pick_tiles(rows, cols)
    grid = (pl.cdiv(rows, tile_m), pl.cdiv(cols, tile_l))

    kernel = functools.partial(_act_kernel, relu_type=relu_type)
    y2d = pl.pallas_call(
        kernel,
        out_shape=jax.ShapeDtypeStruct((rows, cols), out_dtype),
        grid=grid,
        in_specs=[pl.BlockSpec((tile_m, tile_l), lambda i, j: (i, j))],
        out_specs=pl.BlockSpec((tile_m, tile_l), lambda i, j: (i, j)),
        compiler_params=pltpu.CompilerParams(
            dimension_semantics=("parallel", "parallel")),
        cost_estimate=pl.CostEstimate(
            flops=2 * total,
            transcendentals=total if relu_type == "selu" else 0,
            bytes_accessed=2 * total * itemsize),
    )(x2d)
    return y2d.reshape(N, C, H, W)


# ----------------------------- pure-JAX reference --------------------------- #
def relu_layer_ref(x, relu_type, prelu_weight=None):
    relu_type = relu_type.lower()
    if relu_type == "relu":
        return jnp.maximum(x, 0.0)
    if relu_type == "leakyrelu":
        return jnp.where(x >= 0, x, 0.2 * x)
    if relu_type == "prelu":
        a = prelu_weight.reshape(1, -1, 1, 1)
        return jnp.where(x >= 0, x, a * x)
    if relu_type == "selu":
        return jax.nn.selu(x)
    if relu_type == "none":
        return x
    raise ValueError(relu_type)


# --------------------------------- main -------------------------------------- #
if __name__ == "__main__":
    key = jax.random.PRNGKey(0)
    N, C, H, W = 2, 4, 16, 16
    x = jax.random.normal(key, (N, C, H, W), jnp.float32)          # NCHW
    prelu_w = jnp.full((C,), 0.25, jnp.float32)                    # nn.PReLU init

    ok = True
    for rt in ["relu", "leakyrelu", "prelu", "selu", "none"]:
        w = prelu_w if rt == "prelu" else None
        out = relu_layer_forward(x, rt, w)
        out = jax.block_until_ready(out)
        ref = relu_layer_ref(x, rt, w)
        assert out.shape == (N, C, H, W), (rt, out.shape)
        assert out.dtype == x.dtype, (rt, out.dtype)
        assert bool(jnp.all(jnp.isfinite(out))), rt
        if not bool(jnp.allclose(out, ref, atol=1e-5, rtol=1e-5)):
            ok = False
            print(f"MISMATCH for relu_type={rt}")

    if ok:
        print("KERNEL_OK")
</pallas_src>

<mosaic_0001>
module attributes {stable_mosaic.version = 11 : i64} {
  func.func @_act_kernel(%arg0: i32, %arg1: i32, %arg2: memref<8x128xf32, #tpu.memory_space<vmem>>, %arg3: memref<8x128xf32, #tpu.memory_space<vmem>>) attributes {dimension_semantics = [#tpu.dimension_semantics<parallel>, #tpu.dimension_semantics<parallel>], iteration_bounds = array<i64: 1, 2>, scalar_prefetch = 0 : i64, scratch_operands = 0 : i64, tpu.core_type = #tpu.core_type<tc>, window_params = [{transform_indices = @transform_0, window_bounds = array<i64: 8, 128>}, {transform_indices = @transform_1, window_bounds = array<i64: 8, 128>}]} {
    %c0 = arith.constant 0 : index
    %c0_0 = arith.constant 0 : index
    %0 = vector.load %arg2[%c0, %c0_0] : memref<8x128xf32, #tpu.memory_space<vmem>>, vector<8x128xf32>
    %cst = arith.constant 0.000000e+00 : f32
    %1 = vector.broadcast %cst : f32 to vector<8x128xf32>
    %2 = arith.maximumf %0, %1 : vector<8x128xf32>
    %c0_1 = arith.constant 0 : index
    %c0_2 = arith.constant 0 : index
    %3 = vector.load %arg3[%c0_1, %c0_2] : memref<8x128xf32, #tpu.memory_space<vmem>>, vector<8x128xf32>
    tpu.vector_store %arg3[%c0_1, %c0_2], %2 {strides = array<i32>} : memref<8x128xf32, #tpu.memory_space<vmem>>, vector<8x128xf32>,
    return
  }
  func.func @transform_0(%arg0: i32, %arg1: i32) -> (i32, i32) {
    %c0_i32 = arith.constant 0 : i32
    return %arg0, %arg1 : i32, i32
  }
  func.func @transform_1(%arg0: i32, %arg1: i32) -> (i32, i32) {
    %c0_i32 = arith.constant 0 : i32
    return %arg0, %arg1 : i32, i32
  }
}

</mosaic_0001>

<bundles_post_ra>
// kernel: tpu_custom_call.1
= control target key start
LH: loop header
LB: loop body
LE: loop exit
PB: predicated region body
PF: predicated region fallthrough
CT: control target
= control target key end

     0   :  { %6 = vsyncpa [#allocation3], 0  ;;  %s624_s0 = inlined_call_operand.hbm [shape: f32[8,256], index: 0, kind: input, shape index: {}]   ;;  %s625_s1 = inlined_call_operand.hbm [shape: f32[8,256], index: 1, kind: output, shape index: {}]  }
   0x1   :  { %8 = vsyncpa [#allocation3 + $0x1], 0 }
   0x2   :  { %9 = vsyncpa [#allocation4], 0 }
   0x3   :  { %11 = vsyncpa [#allocation4 + $0x1], 0  ;;  %s452_s6 = smov 0   ;;  %s454_s7 = smov 0  }
   0x4   :  { %s456_s8 = smov 0   ;;  %s458_s9 = smov 0  }
   0x5   :  { %s460_s10 = smov 0   ;;  %s462_s11 = smov 0  }
   0x6 LB: > { %s251_s12 = sadd.s32 4294967295, %s438_s11   ;;  %s252_s13 = sadd.s32 4294967294, %s438_s11   ;;  %s438_s11 = sphi %s462_s11, %s17_s11   ;;  %s434_s10 = sphi %s460_s10, %s641_s10   ;;  %s430_s9 = sphi %s458_s9, %s640_s9   ;;  %s426_s8 = sphi %s456_s8, %s639_s8   ;;  %s422_s7 = sphi %s454_s7, %s638_s7   ;;  %s418_s6 = sphi %s452_s6, %s637_s6  }
   0x7   : > { %s26_s14 = sadd.s32 1, %s434_s10  ;;  %s38_s15 = sadd.s32 1, %s426_s8 }
   0x8   : > { %p27_p0 = scmp.ge.s32.totalorder %s26_s14, 2  ;;  %p45_p1 = scmp.ne.s32.totalorder %s426_s8, %s422_s7 }
   0x9   : > { %p46_p2 = scmp.eq.s32.totalorder %s438_s11, 0  ;;  %p51_p3 = scmp.ne.s32.totalorder %s422_s7, %s418_s6 }
   0xa   : > { %s643_s14 = smov (%p27_p0, %s26_s14), 0  ;;  %p52_p5 = scmp.eq.s32.totalorder %s251_s12, 0 }
   0xb   : > { %p493_p4 = por %p46_p2, %p45_p1  ;;  %s34_s17 = ssub.s32 %s434_s10, %s643_s14 }
   0xc   : > { %p77_p6 = scmp.eq.s32.totalorder %s251_s12, 1  ;;  %p36_p7 = scmp.eq.s32.totalorder %s34_s17, 0 }
   0xd   : > { %p499_p8 = por %p52_p5, %p51_p3  ;;  %p83_p10 = scmp.eq.s32.totalorder %s252_s13, 1 }
   0xe   : > { %p503_p9 = por %p77_p6, %p45_p1  ;;  %p276_p13 = scmp.lt.s32.totalorder %s438_s11, 2 }
   0xf   : > { %s508_s20 = scalar_select %p36_p7, %s426_s8, %s38_s15  }
  0x10   : > { %s629_s19 = scalar_select %p503_p9, 1, 0 }
  0x11   : > { %p510_p11 = por %p83_p10, %p51_p3  ;;  %s103_s22 = sand.u32 1, %s426_s8  }
  0x12   : > { %s255_s23 = sshll.u32 %s103_s22, 3  ;;  %s256_s24 = sshll.u32 %s434_s10, 7 }
  0x13   : > { %s630_s21 = scalar_select %p510_p11, 1, 0 }
  0x14   : > { %s521_s27 = scalar_lea.hbm %s624_s0, %s256_s24  ;;  %s107_s28 = scalar_lea.vmem [#allocation2], %s255_s23 }
  0x15   : > { %s116_s29 = sshll.u32 %s107_s28, 4  ;;  %p527_p0 = pnand %p276_p13, %p493_p4  ;;  %s523_s29 = int_to_ptr.vmem [resolvable:$true] %s116_s29 }
  0x16   : > { %s104_s2 = scalar_lea.sflag [#allocation3], %s103_s22  ;;  %s326_s3 = scalar_lea.hbm %s521_s27, 128 }
  0x17   : > { %p327_p3 = scmp.ne.s32.totalorder %s521_s27, %s326_s3  ;;  %p328_p5 = pneg %p527_p0 }
  0x18   : > { %s331_s12 = scalar_lea.hbm %s624_s0, 256  ;;  %p332_p4 = scmp.lt.u32.totalorder %s521_s27, %s624_s0 }
  0x19   : > { %p329_p6 = pnand %p328_p5, %p327_p3  ;;  %p333_p10 = scmp.lt.u32.totalorder %s331_s12, %s326_s3 }
  0x1a   : > { %p335_p12 = scmp.lt.u32.totalorder %s326_s3, %s521_s27 }
  0x1b   : > { %p330_p7 = pneg %p329_p6  ;;  %p334_p13 = por %p333_p10, %p332_p4 }
  0x1d   : > { %p336_p1 = por %p335_p12, %p334_p13 }
  0x1f   : > { %p337_p2 = pnand %p336_p1, %p330_p7 }
  0x21   : > { %340 = shalt.err (!%p337_p2)
}
  0x22   : > { %s341_s16 = scalar_lea.vmem %s523_s29, 128  ;;  %s440_s17 = smov [#allocation2]  }
  0x23   : > { %p342_p3 = scmp.ne.s32.totalorder %s523_s29, %s341_s16  ;;  %s346_s22 = sshll.u32 %s440_s17, 4  ;;  %s347_s22 = int_to_ptr.vmem [resolvable:$false] %s346_s22 }
  0x24   : > { %s348_s23 = scalar_lea.vmem %s347_s22, 256  ;;  %p349_p9 = scmp.lt.s32.totalorder %s523_s29, %s347_s22 }
  0x25   : > { %p344_p6 = pnand %p342_p3, %p328_p5  ;;  %p350_p4 = scmp.lt.s32.totalorder %s348_s23, %s341_s16 }
  0x27   : > { %p345_p11 = pneg %p344_p6  ;;  %p351_p10 = por %p350_p4, %p349_p9 }
  0x29   : > { %p352_p12 = pnand %p351_p10, %p345_p11 }
  0x2b   : > { %355 = shalt.err (!%p352_p12)
}
  0x2c   : > { %271 = dma.hbm_to_vmem [thread:$0]  (!%p527_p0), %s521_s27, 128, %s523_s29, %s104_s2  }
  0x2d   : > { %p632_p1 = scmp.lt.s32.totalorder %s438_s11, 3  ;;  %p633_p2 = scmp.ge.s32.totalorder %s438_s11, 1 }
  0x2f   : > { %p122_p5 = pnand %p633_p2, %p632_p1 }
  0x30   : > { %s563_s24 = sand.u32 (!%p122_p5), 1, %s422_s7  }
  0x31   : > { %125 = sbr.rel (%p122_p5) target bundleno = 83 (0x53), region = 24  ;;  %s258_s25 = sshll.u32 (!%p122_p5), %s563_s24, 3 }
  0x32   : > { %s128_s26 = scalar_lea.sflag (!%p122_p5), [#allocation3], %s563_s24  ;;  %s131_s28 = scalar_lea.vmem (!%p122_p5), [#allocation2], %s258_s25 }
  0x38   : > { %409 = dma.done.wait (%p499_p8), %s128_s26, 128  }
  0x39   : > { %411 = vsyncadd (%p499_p8), %s128_s26, 4294967168  ;;  %s149_s27 = scalar_lea.vmem [#allocation5], %s258_s25  ;;  %s261_s30 = sshll.u32 %s430_s9, 7  ;;  %v150_v0 = vld [vmem:[%s131_s28] sm:$0xff] }
  0x3a   : > { %s169_s29 = sshll.u32 %s149_s27, 4  ;;  %v151_v1 = vmax.f32 %v150_v0, 0.0  ;;  %s577_s4 = scalar_lea.hbm %s625_s1, %s261_s30  ;;  %s572_s29 = int_to_ptr.vmem [resolvable:$true] %s169_s29 }
  0x3b   : > { %s154_s18 = scalar_lea.sflag [#allocation4], %s563_s24  ;;  %s356_s5 = scalar_lea.vmem %s572_s29, 128 }
  0x3c   : > { %152 = vst [vmem:[%s149_s27] sm:$0xff] %v151_v1  ;;  %p357_p8 = scmp.ne.s32.totalorder %s572_s29, %s356_s5  ;;  %p634_p9 = scmp.ne.s32.totalorder %s629_s19, 0 }
  0x3d   : > { %s441_s9 = smov [#allocation5]  }
  0x3e   : > { %p358_p11 = pnand %p357_p8, %p634_p9  ;;  %s360_s12 = sshll.u32 %s441_s9, 4  ;;  %s361_s12 = int_to_ptr.vmem [resolvable:$false] %s360_s12 }
  0x3f   : > { %s362_s13 = scalar_lea.vmem %s361_s12, 256  ;;  %p363_p7 = scmp.lt.s32.totalorder %s572_s29, %s361_s12 }
  0x40   : > { %p359_p0 = pneg %p358_p11  ;;  %p364_p13 = scmp.lt.s32.totalorder %s362_s13, %s356_s5 }
  0x42   : > { %p365_p3 = por %p364_p13, %p363_p7 }
  0x44   : > { %p366_p6 = pnand %p365_p3, %p359_p0 }
  0x46   : > { %369 = shalt.err (!%p366_p6)
}
  0x47   : > { %s370_s15 = scalar_lea.hbm %s577_s4, 128  ;;  %s374_s22 = scalar_lea.hbm %s625_s1, 256 }
  0x48   : > { %p371_p4 = scmp.ne.s32.totalorder %s577_s4, %s370_s15  ;;  %p375_p1 = scmp.lt.u32.totalorder %s577_s4, %s625_s1 }
  0x49   : > { %p376_p2 = scmp.lt.u32.totalorder %s374_s22, %s370_s15  ;;  %p378_p8 = scmp.lt.u32.totalorder %s370_s15, %s577_s4 }
  0x4a   : > { %p372_p10 = pnand %p371_p4, %p634_p9 }
  0x4b   : > { %p377_p5 = por %p376_p2, %p375_p1 }
  0x4c   : > { %p373_p12 = pneg %p372_p10 }
  0x4d   : > { %p379_p11 = por %p378_p8, %p377_p5 }
  0x4f   : > { %p380_p0 = pnand %p379_p11, %p373_p12 }
  0x51   : > { %383 = shalt.err (!%p380_p0)
}
  0x52   : > { %266 = dma.vmem_to_hbm [thread:$0]  (%p634_p9), %s572_s29, 128, %s577_s4, %s154_s18  }
  0x53 PF: > { %s181_s25 = sand.u32 1, %s418_s6   ;;  %p635_p7 = scmp.ne.s32.totalorder %s630_s21, 0 }
  0x54   : > { %p636_p13 = scmp.ge.s32.totalorder %s438_s11, 2  ;;  %s182_s26 = scalar_lea.sflag [#allocation4], %s181_s25 }
  0x56   : > { %p273_p3 = pnand %p636_p13, %p635_p7 }
  0x58   : > { %413 = dma.done.wait (!%p273_p3), %s182_s26, 128  }
  0x59   : > { %415 = vsyncadd (!%p273_p3), %s182_s26, 4294967168  ;;  %s17_s11 = sadd.s32 1, %s438_s11   ;;  %s637_s6 = smov %s422_s7 }
  0x5a   : > { %p14_p6 = scmp.ge.s32.totalorder %s17_s11, 4   ;;  %s638_s7 = smov %s426_s8 }
  0x5b   : > { %s639_s8 = smov %s508_s20  ;;  %s640_s9 = smov %s434_s10 }
  0x5c   : > { %s641_s10 = smov %s643_s14  ;;  %16 = sbr.rel (!%p14_p6) target bundleno = 6 (0x6), region = 69 }
  0x63   :  { %187 = vsyncpa [#allocation3], 1 }
  0x64   :  { %189 = vsyncpa [#allocation3 + $0x1], 1 }
  0x65   :  { %190 = vsyncpa [#allocation4], 1 }
  0x66   :  { %192 = vsyncpa [#allocation4 + $0x1], 1 }

</bundles_post_ra>
